<compile_context>
chip_gen: v5e
topology: v5e:2x2
jax: 0.10.0
libtpu: 0.0.40
codegen_flags: <defaults>
</compile_context>

<pallas_src>
import functools

import jax
import jax.numpy as jnp
from jax.experimental import pallas as pl
from jax.experimental.pallas import tpu as pltpu


_VMEM_LIMIT = 32 * 1024 * 1024   # safe on v5e/v6e (128 MiB phys) and v7x (64 MiB phys)
_LANE = 128
_SUBLANE = 8


def _round_up(x, m):
    return (x + m - 1) // m * m


# ----------------------------------------------------------------------------
# Pallas kernels
# ----------------------------------------------------------------------------
def _matmul_bias_relu_kernel(x_ref, w_ref, b_ref, o_ref):
    # x: (TM, K) bf16, w: (K, Np) bf16 (VMEM-resident), b: (1, Np) f32
    y = jnp.dot(x_ref[...], w_ref[...], preferred_element_type=jnp.float32)
    o_ref[...] = jnp.maximum(y + b_ref[...], 0.0).astype(o_ref.dtype)


def _fused_dw_pw_kernel(stride, r0_ref, r1_ref, r2_ref,
                        wdw_ref, bdw_ref, wpw_ref, bpw_ref, o_ref):
    # r*_ref: (1, 1, G, Wc, C) bf16 -- three row-shifted views of the padded input
    # wdw: (9, 1, C) f32, bdw: (1, C) f32          (folded BN, depthwise)
    # wpw: (C, Np) bf16 (resident), bpw: (1, Np) f32 (folded BN, pointwise)
    # o:   (1, 1, Wo, Np)
    Wo = o_ref.shape[2]
    rows = (r0_ref[...][0, 0], r1_ref[...][0, 0], r2_ref[...][0, 0])  # (G, Wc, C)
    C = rows[0].shape[-1]
    wdw = wdw_ref[...]                                                # (9, 1, C)

    acc = jnp.zeros((Wo, C), jnp.float32)
    for dy in range(3):                       # static unroll over 3x3 taps
        r = rows[dy]
        if stride == 1:
            taps = (r[0, 0:Wo, :], r[0, 1:Wo + 1, :], r[0, 2:Wo + 2, :])
        else:                                 # stride 2: plane0=even cols, plane1=odd
            taps = (r[0, 0:Wo, :], r[1, 0:Wo, :], r[0, 1:Wo + 1, :])
        for dx in range(3):
            acc = acc + taps[dx].astype(jnp.float32) * wdw[3 * dy + dx]

    dw = jnp.maximum(acc + bdw_ref[...], 0.0)                         # (Wo, C) f32
    y = jnp.dot(dw.astype(jnp.bfloat16), wpw_ref[...],
                preferred_element_type=jnp.float32)                   # (Wo, Np)
    out = jnp.maximum(y + bpw_ref[...], 0.0)
    o_ref[...] = out.astype(o_ref.dtype)[None, None]


# ----------------------------------------------------------------------------
# Pallas wrappers
# ----------------------------------------------------------------------------
def matmul_bias_relu(x2d, w, b, out_dtype=jnp.float32, tm=512):
    """relu(x2d @ w + b); rows tiled over the grid, w columns pre-padded to 128."""
    M, K = x2d.shape
    Np = w.shape[1]
    Kp = _round_up(K, _SUBLANE)
    TM = min(tm, _round_up(M, _SUBLANE))
    Mp = _round_up(M, TM)

    x_p = jnp.pad(x2d, ((0, Mp - M), (0, Kp - K))).astype(jnp.bfloat16)
    w_p = jnp.pad(w, ((0, Kp - K), (0, 0))).astype(jnp.bfloat16)
    b_p = b.astype(jnp.float32)

    out_bytes = Mp * Np * jnp.dtype(out_dtype).itemsize
    cost = pl.CostEstimate(
        flops=2 * Mp * Kp * Np,
        transcendentals=0,
        bytes_accessed=x_p.size * 2 + w_p.size * 2 + b_p.size * 4 + out_bytes)

    out = pl.pallas_call(
        _matmul_bias_relu_kernel,
        out_shape=jax.ShapeDtypeStruct((Mp, Np), out_dtype),
        grid=(Mp // TM,),
        in_specs=[
            pl.BlockSpec((TM, Kp), lambda i: (i, 0)),
            pl.BlockSpec((Kp, Np), lambda i: (0, 0)),   # weight VMEM-resident
            pl.BlockSpec((1, Np), lambda i: (0, 0)),
        ],
        out_specs=pl.BlockSpec((TM, Np), lambda i: (i, 0)),
        compiler_params=pltpu.CompilerParams(
            dimension_semantics=("parallel",),
            vmem_limit_bytes=_VMEM_LIMIT),
        cost_estimate=cost,
    )(x_p, w_p, b_p)
    return out[:M]


def _prep_dw_cols(x_nhwc, stride, pad=1):
    """Spatial pad + column pre-arrangement so the kernel only needs contiguous
    static slices. stride 1 -> (N, Hp, 1, W+2, C); stride 2 -> even/odd planes
    (N, Hp, 2, Wo+1, C)."""
    N, H, W, C = x_nhwc.shape
    xp = jnp.pad(x_nhwc, ((0, 0), (pad, pad), (pad, pad), (0, 0)))
    Ho = (H + 2 * pad - 3) // stride + 1
    Wo = (W + 2 * pad - 3) // stride + 1
    if stride == 1:
        cols = xp[:, :, None, :, :]                           # (N, Hp, 1, W+2, C)
    else:
        Wc = Wo + 1
        even = xp[:, :, 0:2 * Wc:2, :][:, :, :Wc, :]          # cols 0,2,...,2*Wo
        odd = xp[:, :, 1:2 * Wc:2, :]                         # cols 1,3,...
        odd = jnp.pad(odd, ((0, 0), (0, 0), (0, Wc - odd.shape[2]), (0, 0)))
        cols = jnp.stack([even, odd], axis=2)                 # (N, Hp, 2, Wc, C)
    return cols.astype(jnp.bfloat16), (N, Ho, Wo)


def fused_dw_pw_bn_relu(x_nhwc, wdw, bdw, wpw, bpw, stride, out_dtype=jnp.float32):
    cols, (N, Ho, Wo) = _prep_dw_cols(x_nhwc, stride)
    _, Hp, G, Wc, C = cols.shape
    Np = wpw.shape[1]

    def row_spec(dy):
        return pl.BlockSpec((1, 1, G, Wc, C),
                            lambda n, y: (n, stride * y + dy, 0, 0, 0))

    kernel = functools.partial(_fused_dw_pw_kernel, stride)
    return pl.pallas_call(
        kernel,
        out_shape=jax.ShapeDtypeStruct((N, Ho, Wo, Np), out_dtype),
        grid=(N, Ho),
        in_specs=[
            row_spec(0), row_spec(1), row_spec(2),
            pl.BlockSpec((9, 1, C), lambda n, y: (0, 0, 0)),
            pl.BlockSpec((1, C), lambda n, y: (0, 0)),
            pl.BlockSpec((C, Np), lambda n, y: (0, 0)),       # pw weight resident
            pl.BlockSpec((1, Np), lambda n, y: (0, 0)),
        ],
        out_specs=pl.BlockSpec((1, 1, Wo, Np), lambda n, y: (n, y, 0, 0)),
        compiler_params=pltpu.CompilerParams(
            dimension_semantics=("parallel", "parallel"),
            vmem_limit_bytes=_VMEM_LIMIT),
    )(cols, cols, cols,
      wdw.astype(jnp.float32), bdw.astype(jnp.float32),
      wpw.astype(jnp.bfloat16), bpw.astype(jnp.float32))


# ----------------------------------------------------------------------------
# Plain-JAX glue: im2col, BN folding, parameter init
# ----------------------------------------------------------------------------
def _im2col_3x3(x_nhwc, stride, pad=1):
    N, H, W, C = x_nhwc.shape
    xp = jnp.pad(x_nhwc, ((0, 0), (pad, pad), (pad, pad), (0, 0)))
    Ho = (H + 2 * pad - 3) // stride + 1
    Wo = (W + 2 * pad - 3) // stride + 1
    cols = []
    for dy in range(3):
        for dx in range(3):
            cols.append(xp[:, dy:dy + stride * Ho:stride,
                           dx:dx + stride * Wo:stride, :])
    patches = jnp.stack(cols, axis=3)                  # (N, Ho, Wo, 9, C)
    return patches.reshape(N * Ho * Wo, 9 * C), (N, Ho, Wo)


def _fold_bn(gamma, beta, mean, var, eps=1e-5):
    scale = gamma / jnp.sqrt(var + eps)
    shift = beta - mean * scale
    return scale, shift


def _init_conv_bn(key, cout, cin, kh, kw):
    k1, k2, k3, k4 = jax.random.split(key, 4)
    w = 0.1 * jax.random.normal(k1, (cout, cin, kh, kw), jnp.float32)
    gamma = 1.0 + 0.1 * jax.random.normal(k2, (cout,), jnp.float32)
    beta = 0.1 * jax.random.normal(k3, (cout,), jnp.float32)
    mean = 0.1 * jax.random.normal(k4, (cout,), jnp.float32)
    var = jnp.ones((cout,), jnp.float32)
    return dict(w=w, gamma=gamma, beta=beta, mean=mean, var=var)


def _pad_last(a, target):
    return jnp.pad(a, [(0, 0)] * (a.ndim - 1) + [(0, target - a.shape[-1])])


class MobileNet:
    """MobileNetV1-style backbone; returns a tuple of two stage features (NCHW)."""

    def __init__(self, in_channels=3, base_channels=16, key=None):
        if key is None:
            key = jax.random.PRNGKey(0)
        ks = jax.random.split(key, 5)
        c0, c1, c2 = base_channels, base_channels * 2, base_channels * 4
        # stem: 3x3 s2 conv-BN-ReLU, in_channels -> c0
        self.stem = _init_conv_bn(ks[0], c0, in_channels, 3, 3)
        # block1: dw 3x3 s1 (c0) + pw 1x1 (c0 -> c1)
        self.dw1 = _init_conv_bn(ks[1], c0, 1, 3, 3)
        self.pw1 = _init_conv_bn(ks[2], c1, c0, 1, 1)
        # block2: dw 3x3 s2 (c1) + pw 1x1 (c1 -> c2)
        self.dw2 = _init_conv_bn(ks[3], c1, 1, 3, 3)
        self.pw2 = _init_conv_bn(ks[4], c2, c1, 1, 1)

    # --- stem: im2col + tiled matmul kernel ---
    def _conv3x3_bn_relu(self, x_nhwc, p, stride):
        cols, (N, Ho, Wo) = _im2col_3x3(x_nhwc, stride)
        scale, shift = _fold_bn(p["gamma"], p["beta"], p["mean"], p["var"])
        cout = p["w"].shape[0]
        w = jnp.transpose(p["w"], (2, 3, 1, 0)).reshape(-1, cout) * scale[None, :]
        b = shift[None, :]
        Np = _round_up(cout, _LANE)                    # lane-dense output store
        out = matmul_bias_relu(cols, _pad_last(w, Np), _pad_last(b, Np),
                               out_dtype=jnp.bfloat16)
        return out[:, :cout].reshape(N, Ho, Wo, cout)

    # --- depthwise + pointwise block: one fused kernel ---
    def _dw_pw_block(self, x_nhwc, p_dw, p_pw, stride):
        C = p_dw["w"].shape[0]
        s_dw, sh_dw = _fold_bn(p_dw["gamma"], p_dw["beta"], p_dw["mean"], p_dw["var"])
        wdw = jnp.transpose(p_dw["w"].reshape(C, 9), (1, 0)).reshape(9, 1, C)
        wdw = wdw * s_dw[None, None, :]
        bdw = sh_dw[None, :]

        cout = p_pw["w"].shape[0]
        s_pw, sh_pw = _fold_bn(p_pw["gamma"], p_pw["beta"], p_pw["mean"], p_pw["var"])
        wpw = jnp.transpose(p_pw["w"].reshape(cout, C), (1, 0)) * s_pw[None, :]
        bpw = sh_pw[None, :]
        Np = _round_up(cout, _LANE)                    # lane-dense output store

        out = fused_dw_pw_bn_relu(x_nhwc, wdw, bdw,
                                  _pad_last(wpw, Np), _pad_last(bpw, Np),
                                  stride, out_dtype=jnp.float32)
        return out[:, :, :, :cout]

    @functools.partial(jax.jit, static_argnums=0)
    def forward(self, x_nchw):
        x = jnp.transpose(x_nchw, (0, 2, 3, 1)).astype(jnp.float32)  # NCHW -> NHWC
        x = self._conv3x3_bn_relu(x, self.stem, stride=2)            # (N, H/2, W/2, c0)
        f1 = self._dw_pw_block(x, self.dw1, self.pw1, stride=1)      # (N, H/2, W/2, c1)
        f2 = self._dw_pw_block(f1, self.dw2, self.pw2, stride=2)     # (N, H/4, W/4, c2)
        # return multi-stage features in PyTorch NCHW convention
        return (jnp.transpose(f1, (0, 3, 1, 2)),
                jnp.transpose(f2, (0, 3, 1, 2)))

    def __call__(self, x):
        return self.forward(x)


if __name__ == "__main__":
    key = jax.random.PRNGKey(0)
    kx, kp = jax.random.split(key)
    x = jax.random.normal(kx, (2, 3, 16, 16), jnp.float32)   # NCHW input, like PyTorch

    model = MobileNet(in_channels=3, base_channels=16, key=kp)
    feats = model(x)
    feats = jax.block_until_ready(feats)

    assert feats[0].shape == (2, 32, 8, 8), feats[0].shape
    assert feats[1].shape == (2, 64, 4, 4), feats[1].shape
    assert all(bool(jnp.all(jnp.isfinite(f))) for f in feats)
    print("KERNEL_OK")
</pallas_src>

<mosaic_0001>
module attributes {stable_mosaic.version = 11 : i64} {
  func.func @_fused_dw_pw_kernel(%arg0: i32, %arg1: i32, %arg2: memref<1x1x1x10x16xbf16, #tpu.memory_space<vmem>>, %arg3: memref<1x1x1x10x16xbf16, #tpu.memory_space<vmem>>, %arg4: memref<1x1x1x10x16xbf16, #tpu.memory_space<vmem>>, %arg5: memref<9x1x16xf32, #tpu.memory_space<vmem>>, %arg6: memref<1x16xf32, #tpu.memory_space<vmem>>, %arg7: memref<16x128xbf16, #tpu.memory_space<vmem>>, %arg8: memref<1x128xf32, #tpu.memory_space<vmem>>, %arg9: memref<1x1x8x128xf32, #tpu.memory_space<vmem>>) attributes {dimension_semantics = [#tpu.dimension_semantics<parallel>, #tpu.dimension_semantics<parallel>], iteration_bounds = array<i64: 2, 8>, scalar_prefetch = 0 : i64, scratch_operands = 0 : i64, tpu.core_type = #tpu.core_type<tc>, window_params = [{transform_indices = @transform_0, window_bounds = array<i64: 1, 1, 1, 10, 16>}, {transform_indices = @transform_1, window_bounds = array<i64: 1, 1, 1, 10, 16>}, {transform_indices = @transform_2, window_bounds = array<i64: 1, 1, 1, 10, 16>}, {pipeline_mode = #tpu.pipeline_mode<synchronous>, transform_indices = @transform_3, window_bounds = array<i64: 9, 1, 16>}, {pipeline_mode = #tpu.pipeline_mode<synchronous>, transform_indices = @transform_4, window_bounds = array<i64: 1, 16>}, {pipeline_mode = #tpu.pipeline_mode<synchronous>, transform_indices = @transform_5, window_bounds = array<i64: 16, 128>}, {pipeline_mode = #tpu.pipeline_mode<synchronous>, transform_indices = @transform_6, window_bounds = array<i64: 1, 128>}, {transform_indices = @transform_7, window_bounds = array<i64: 1, 1, 8, 128>}]} {
    %c0 = arith.constant 0 : index
    %c0_0 = arith.constant 0 : index
    %c0_1 = arith.constant 0 : index
    %c0_2 = arith.constant 0 : index
    %c0_3 = arith.constant 0 : index
    %0 = vector.load %arg2[%c0, %c0_0, %c0_1, %c0_2, %c0_3] : memref<1x1x1x10x16xbf16, #tpu.memory_space<vmem>>, vector<1x1x1x10x16xbf16>
    %1 = vector.shape_cast %0 : vector<1x1x1x10x16xbf16> to vector<1x10x16xbf16>
    %c0_4 = arith.constant 0 : index
    %c0_5 = arith.constant 0 : index
    %c0_6 = arith.constant 0 : index
    %c0_7 = arith.constant 0 : index
    %c0_8 = arith.constant 0 : index
    %2 = vector.load %arg3[%c0_4, %c0_5, %c0_6, %c0_7, %c0_8] : memref<1x1x1x10x16xbf16, #tpu.memory_space<vmem>>, vector<1x1x1x10x16xbf16>
    %3 = vector.shape_cast %2 : vector<1x1x1x10x16xbf16> to vector<1x10x16xbf16>
    %c0_9 = arith.constant 0 : index
    %c0_10 = arith.constant 0 : index
    %c0_11 = arith.constant 0 : index
    %c0_12 = arith.constant 0 : index
    %c0_13 = arith.constant 0 : index
    %4 = vector.load %arg4[%c0_9, %c0_10, %c0_11, %c0_12, %c0_13] : memref<1x1x1x10x16xbf16, #tpu.memory_space<vmem>>, vector<1x1x1x10x16xbf16>
    %5 = vector.shape_cast %4 : vector<1x1x1x10x16xbf16> to vector<1x10x16xbf16>
    %c0_14 = arith.constant 0 : index
    %c0_15 = arith.constant 0 : index
    %c0_16 = arith.constant 0 : index
    %6 = vector.load %arg5[%c0_14, %c0_15, %c0_16] : memref<9x1x16xf32, #tpu.memory_space<vmem>>, vector<9x1x16xf32>
    %cst = arith.constant 0.000000e+00 : f32
    %7 = vector.broadcast %cst : f32 to vector<8x16xf32>
    %8 = vector.extract_strided_slice %1 {offsets = [0, 0, 0], sizes = [1, 8, 16], strides = [1, 1, 1]} : vector<1x10x16xbf16> to vector<1x8x16xbf16>
    %9 = vector.shape_cast %8 : vector<1x8x16xbf16> to vector<8x16xbf16>
    %10 = vector.extract_strided_slice %1 {offsets = [0, 1, 0], sizes = [1, 8, 16], strides = [1, 1, 1]} : vector<1x10x16xbf16> to vector<1x8x16xbf16>
    %11 = vector.shape_cast %10 : vector<1x8x16xbf16> to vector<8x16xbf16>
    %12 = vector.extract_strided_slice %1 {offsets = [0, 2, 0], sizes = [1, 8, 16], strides = [1, 1, 1]} : vector<1x10x16xbf16> to vector<1x8x16xbf16>
    %13 = vector.shape_cast %12 : vector<1x8x16xbf16> to vector<8x16xbf16>
    %14 = arith.extf %9 : vector<8x16xbf16> to vector<8x16xf32>
    %15 = vector.extract_strided_slice %6 {offsets = [0, 0, 0], sizes = [1, 1, 16], strides = [1, 1, 1]} : vector<9x1x16xf32> to vector<1x1x16xf32>
    %16 = vector.shape_cast %15 : vector<1x1x16xf32> to vector<1x16xf32>
    %17 = vector.broadcast %16 : vector<1x16xf32> to vector<8x16xf32>
    %18 = arith.mulf %14, %17 : vector<8x16xf32>
    %19 = arith.addf %7, %18 : vector<8x16xf32>
    %20 = arith.extf %11 : vector<8x16xbf16> to vector<8x16xf32>
    %21 = vector.extract_strided_slice %6 {offsets = [1, 0, 0], sizes = [1, 1, 16], strides = [1, 1, 1]} : vector<9x1x16xf32> to vector<1x1x16xf32>
    %22 = vector.shape_cast %21 : vector<1x1x16xf32> to vector<1x16xf32>
    %23 = vector.broadcast %22 : vector<1x16xf32> to vector<8x16xf32>
    %24 = arith.mulf %20, %23 : vector<8x16xf32>
    %25 = arith.addf %19, %24 : vector<8x16xf32>
    %26 = arith.extf %13 : vector<8x16xbf16> to vector<8x16xf32>
    %27 = vector.extract_strided_slice %6 {offsets = [2, 0, 0], sizes = [1, 1, 16], strides = [1, 1, 1]} : vector<9x1x16xf32> to vector<1x1x16xf32>
    %28 = vector.shape_cast %27 : vector<1x1x16xf32> to vector<1x16xf32>
    %29 = vector.broadcast %28 : vector<1x16xf32> to vector<8x16xf32>
    %30 = arith.mulf %26, %29 : vector<8x16xf32>
    %31 = arith.addf %25, %30 : vector<8x16xf32>
    %32 = vector.extract_strided_slice %3 {offsets = [0, 0, 0], sizes = [1, 8, 16], strides = [1, 1, 1]} : vector<1x10x16xbf16> to vector<1x8x16xbf16>
    %33 = vector.shape_cast %32 : vector<1x8x16xbf16> to vector<8x16xbf16>
    %34 = vector.extract_strided_slice %3 {offsets = [0, 1, 0], sizes = [1, 8, 16], strides = [1, 1, 1]} : vector<1x10x16xbf16> to vector<1x8x16xbf16>
    %35 = vector.shape_cast %34 : vector<1x8x16xbf16> to vector<8x16xbf16>
    %36 = vector.extract_strided_slice %3 {offsets = [0, 2, 0], sizes = [1, 8, 16], strides = [1, 1, 1]} : vector<1x10x16xbf16> to vector<1x8x16xbf16>
    %37 = vector.shape_cast %36 : vector<1x8x16xbf16> to vector<8x16xbf16>
    %38 = arith.extf %33 : vector<8x16xbf16> to vector<8x16xf32>
    %39 = vector.extract_strided_slice %6 {offsets = [3, 0, 0], sizes = [1, 1, 16], strides = [1, 1, 1]} : vector<9x1x16xf32> to vector<1x1x16xf32>
    %40 = vector.shape_cast %39 : vector<1x1x16xf32> to vector<1x16xf32>
    %41 = vector.broadcast %40 : vector<1x16xf32> to vector<8x16xf32>
    %42 = arith.mulf %38, %41 : vector<8x16xf32>
    %43 = arith.addf %31, %42 : vector<8x16xf32>
    %44 = arith.extf %35 : vector<8x16xbf16> to vector<8x16xf32>
    %45 = vector.extract_strided_slice %6 {offsets = [4, 0, 0], sizes = [1, 1, 16], strides = [1, 1, 1]} : vector<9x1x16xf32> to vector<1x1x16xf32>
    %46 = vector.shape_cast %45 : vector<1x1x16xf32> to vector<1x16xf32>
    %47 = vector.broadcast %46 : vector<1x16xf32> to vector<8x16xf32>
    %48 = arith.mulf %44, %47 : vector<8x16xf32>
    %49 = arith.addf %43, %48 : vector<8x16xf32>
    %50 = arith.extf %37 : vector<8x16xbf16> to vector<8x16xf32>
    %51 = vector.extract_strided_slice %6 {offsets = [5, 0, 0], sizes = [1, 1, 16], strides = [1, 1, 1]} : vector<9x1x16xf32> to vector<1x1x16xf32>
    %52 = vector.shape_cast %51 : vector<1x1x16xf32> to vector<1x16xf32>
    %53 = vector.broadcast %52 : vector<1x16xf32> to vector<8x16xf32>
    %54 = arith.mulf %50, %53 : vector<8x16xf32>
    %55 = arith.addf %49, %54 : vector<8x16xf32>
    %56 = vector.extract_strided_slice %5 {offsets = [0, 0, 0], sizes = [1, 8, 16], strides = [1, 1, 1]} : vector<1x10x16xbf16> to vector<1x8x16xbf16>
    %57 = vector.shape_cast %56 : vector<1x8x16xbf16> to vector<8x16xbf16>
    %58 = vector.extract_strided_slice %5 {offsets = [0, 1, 0], sizes = [1, 8, 16], strides = [1, 1, 1]} : vector<1x10x16xbf16> to vector<1x8x16xbf16>
    %59 = vector.shape_cast %58 : vector<1x8x16xbf16> to vector<8x16xbf16>
    %60 = vector.extract_strided_slice %5 {offsets = [0, 2, 0], sizes = [1, 8, 16], strides = [1, 1, 1]} : vector<1x10x16xbf16> to vector<1x8x16xbf16>
    %61 = vector.shape_cast %60 : vector<1x8x16xbf16> to vector<8x16xbf16>
    %62 = arith.extf %57 : vector<8x16xbf16> to vector<8x16xf32>
    %63 = vector.extract_strided_slice %6 {offsets = [6, 0, 0], sizes = [1, 1, 16], strides = [1, 1, 1]} : vector<9x1x16xf32> to vector<1x1x16xf32>
    %64 = vector.shape_cast %63 : vector<1x1x16xf32> to vector<1x16xf32>
    %65 = vector.broadcast %64 : vector<1x16xf32> to vector<8x16xf32>
    %66 = arith.mulf %62, %65 : vector<8x16xf32>
    %67 = arith.addf %55, %66 : vector<8x16xf32>
    %68 = arith.extf %59 : vector<8x16xbf16> to vector<8x16xf32>
    %69 = vector.extract_strided_slice %6 {offsets = [7, 0, 0], sizes = [1, 1, 16], strides = [1, 1, 1]} : vector<9x1x16xf32> to vector<1x1x16xf32>
    %70 = vector.shape_cast %69 : vector<1x1x16xf32> to vector<1x16xf32>
    %71 = vector.broadcast %70 : vector<1x16xf32> to vector<8x16xf32>
    %72 = arith.mulf %68, %71 : vector<8x16xf32>
    %73 = arith.addf %67, %72 : vector<8x16xf32>
    %74 = arith.extf %61 : vector<8x16xbf16> to vector<8x16xf32>
    %75 = vector.extract_strided_slice %6 {offsets = [8, 0, 0], sizes = [1, 1, 16], strides = [1, 1, 1]} : vector<9x1x16xf32> to vector<1x1x16xf32>
    %76 = vector.shape_cast %75 : vector<1x1x16xf32> to vector<1x16xf32>
    %77 = vector.broadcast %76 : vector<1x16xf32> to vector<8x16xf32>
    %78 = arith.mulf %74, %77 : vector<8x16xf32>
    %79 = arith.addf %73, %78 : vector<8x16xf32>
    %c0_17 = arith.constant 0 : index
    %c0_18 = arith.constant 0 : index
    %80 = vector.load %arg6[%c0_17, %c0_18] : memref<1x16xf32, #tpu.memory_space<vmem>>, vector<1x16xf32>
    %81 = vector.broadcast %80 : vector<1x16xf32> to vector<8x16xf32>
    %82 = arith.addf %79, %81 : vector<8x16xf32>
    %cst_19 = arith.constant 0.000000e+00 : f32
    %83 = vector.broadcast %cst_19 : f32 to vector<8x16xf32>
    %84 = arith.maximumf %82, %83 : vector<8x16xf32>
    %85 = arith.truncf %84 : vector<8x16xf32> to vector<8x16xbf16>
    %c0_20 = arith.constant 0 : index
    %c0_21 = arith.constant 0 : index
    %86 = vector.load %arg7[%c0_20, %c0_21] : memref<16x128xbf16, #tpu.memory_space<vmem>>, vector<16x128xbf16>
    %cst_22 = arith.constant dense<0.000000e+00> : vector<8x128xf32>
    %87 = tpu.matmul %85, %86, %cst_22 {dimension_numbers = #tpu.dot_dimension_numbers<[1], [0], [0], [1], [0, 0, 1, 1], [], []>} : vector<8x16xbf16>, vector<16x128xbf16>, vector<8x128xf32> -> vector<8x128xf32>
    %c0_23 = arith.constant 0 : index
    %c0_24 = arith.constant 0 : index
    %88 = vector.load %arg8[%c0_23, %c0_24] : memref<1x128xf32, #tpu.memory_space<vmem>>, vector<1x128xf32>
    %89 = vector.broadcast %88 : vector<1x128xf32> to vector<8x128xf32>
    %90 = arith.addf %87, %89 : vector<8x128xf32>
    %cst_25 = arith.constant 0.000000e+00 : f32
    %91 = vector.broadcast %cst_25 : f32 to vector<8x128xf32>
    %92 = arith.maximumf %90, %91 : vector<8x128xf32>
    %93 = vector.shape_cast %92 : vector<8x128xf32> to vector<1x1x8x128xf32>
    %c0_26 = arith.constant 0 : index
    %c0_27 = arith.constant 0 : index
    %c0_28 = arith.constant 0 : index
    %c0_29 = arith.constant 0 : index
    %94 = vector.load %arg9[%c0_26, %c0_27, %c0_28, %c0_29] : memref<1x1x8x128xf32, #tpu.memory_space<vmem>>, vector<1x1x8x128xf32>
    tpu.vector_store %arg9[%c0_26, %c0_27, %c0_28, %c0_29], %93 {strides = array<i32>} : memref<1x1x8x128xf32, #tpu.memory_space<vmem>>, vector<1x1x8x128xf32>,
    return
  }
  func.func @transform_0(%arg0: i32, %arg1: i32) -> (i32, i32, i32, i32, i32) {
    %c1_i32 = arith.constant 1 : i32
    %0 = arith.muli %c1_i32, %arg1 : i32
    %c0_i32 = arith.constant 0 : i32
    %1 = arith.addi %0, %c0_i32 : i32
    %c0_i32_0 = arith.constant 0 : i32
    %c0_i32_1 = arith.constant 0 : i32
    %c0_i32_2 = arith.constant 0 : i32
    %c0_i32_3 = arith.constant 0 : i32
    return %arg0, %1, %c0_i32_0, %c0_i32_1, %c0_i32_2 : i32, i32, i32, i32, i32
  }
  func.func @transform_1(%arg0: i32, %arg1: i32) -> (i32, i32, i32, i32, i32) {
    %c1_i32 = arith.constant 1 : i32
    %0 = arith.muli %c1_i32, %arg1 : i32
    %c1_i32_0 = arith.constant 1 : i32
    %1 = arith.addi %0, %c1_i32_0 : i32
    %c0_i32 = arith.constant 0 : i32
    %c0_i32_1 = arith.constant 0 : i32
    %c0_i32_2 = arith.constant 0 : i32
    %c0_i32_3 = arith.constant 0 : i32
    return %arg0, %1, %c0_i32, %c0_i32_1, %c0_i32_2 : i32, i32, i32, i32, i32
  }
  func.func @transform_2(%arg0: i32, %arg1: i32) -> (i32, i32, i32, i32, i32) {
    %c1_i32 = arith.constant 1 : i32
    %0 = arith.muli %c1_i32, %arg1 : i32
    %c2_i32 = arith.constant 2 : i32
    %1 = arith.addi %0, %c2_i32 : i32
    %c0_i32 = arith.constant 0 : i32
    %c0_i32_0 = arith.constant 0 : i32
    %c0_i32_1 = arith.constant 0 : i32
    %c0_i32_2 = arith.constant 0 : i32
    return %arg0, %1, %c0_i32, %c0_i32_0, %c0_i32_1 : i32, i32, i32, i32, i32
  }
  func.func @transform_3(%arg0: i32, %arg1: i32) -> (i32, i32, i32) {
    %c0_i32 = arith.constant 0 : i32
    %c0_i32_0 = arith.constant 0 : i32
    %c0_i32_1 = arith.constant 0 : i32
    %c0_i32_2 = arith.constant 0 : i32
    return %c0_i32, %c0_i32_0, %c0_i32_1 : i32, i32, i32
  }
  func.func @transform_4(%arg0: i32, %arg1: i32) -> (i32, i32) {
    %c0_i32 = arith.constant 0 : i32
    %c0_i32_0 = arith.constant 0 : i32
    %c0_i32_1 = arith.constant 0 : i32
    return %c0_i32, %c0_i32_0 : i32, i32
  }
  func.func @transform_5(%arg0: i32, %arg1: i32) -> (i32, i32) {
    %c0_i32 = arith.constant 0 : i32
    %c0_i32_0 = arith.constant 0 : i32
    %c0_i32_1 = arith.constant 0 : i32
    return %c0_i32, %c0_i32_0 : i32, i32
  }
  func.func @transform_6(%arg0: i32, %arg1: i32) -> (i32, i32) {
    %c0_i32 = arith.constant 0 : i32
    %c0_i32_0 = arith.constant 0 : i32
    %c0_i32_1 = arith.constant 0 : i32
    return %c0_i32, %c0_i32_0 : i32, i32
  }
  func.func @transform_7(%arg0: i32, %arg1: i32) -> (i32, i32, i32, i32) {
    %c0_i32 = arith.constant 0 : i32
    %c0_i32_0 = arith.constant 0 : i32
    %c0_i32_1 = arith.constant 0 : i32
    return %arg0, %arg1, %c0_i32, %c0_i32_0 : i32, i32, i32, i32
  }
}

module attributes {stable_mosaic.version = 11 : i64} {
  func.func @_matmul_bias_relu_kernel(%arg0: i32, %arg1: memref<128x32xbf16, #tpu.memory_space<vmem>>, %arg2: memref<32x128xbf16, #tpu.memory_space<vmem>>, %arg3: memref<1x128xf32, #tpu.memory_space<vmem>>, %arg4: memref<128x128xbf16, #tpu.memory_space<vmem>>) attributes {dimension_semantics = [#tpu.dimension_semantics<parallel>], iteration_bounds = array<i64: 1>, scalar_prefetch = 0 : i64, scratch_operands = 0 : i64, tpu.core_type = #tpu.core_type<tc>, window_params = [{transform_indices = @transform_0, window_bounds = array<i64: 128, 32>}, {pipeline_mode = #tpu.pipeline_mode<synchronous>, transform_indices = @transform_1, window_bounds = array<i64: 32, 128>}, {pipeline_mode = #tpu.pipeline_mode<synchronous>, transform_indices = @transform_2, window_bounds = array<i64: 1, 128>}, {transform_indices = @transform_3, window_bounds = array<i64: 128, 128>}]} {
    %c0 = arith.constant 0 : index
    %c0_0 = arith.constant 0 : index
    %0 = vector.load %arg1[%c0, %c0_0] : memref<128x32xbf16, #tpu.memory_space<vmem>>, vector<128x32xbf16>
    %c0_1 = arith.constant 0 : index
    %c0_2 = arith.constant 0 : index
    %1 = vector.load %arg2[%c0_1, %c0_2] : memref<32x128xbf16, #tpu.memory_space<vmem>>, vector<32x128xbf16>
    %cst = arith.constant dense<0.000000e+00> : vector<128x128xf32>
    %2 = tpu.matmul %0, %1, %cst {dimension_numbers = #tpu.dot_dimension_numbers<[1], [0], [0], [1], [0, 0, 1, 1], [], []>} : vector<128x32xbf16>, vector<32x128xbf16>, vector<128x128xf32> -> vector<128x128xf32>
    %c0_3 = arith.constant 0 : index
    %c0_4 = arith.constant 0 : index
    %3 = vector.load %arg3[%c0_3, %c0_4] : memref<1x128xf32, #tpu.memory_space<vmem>>, vector<1x128xf32>
    %4 = vector.broadcast %3 : vector<1x128xf32> to vector<128x128xf32>
    %5 = arith.addf %2, %4 : vector<128x128xf32>
    %cst_5 = arith.constant 0.000000e+00 : f32
    %6 = vector.broadcast %cst_5 : f32 to vector<128x128xf32>
    %7 = arith.maximumf %5, %6 : vector<128x128xf32>
    %8 = arith.truncf %7 : vector<128x128xf32> to vector<128x128xbf16>
    %c0_6 = arith.constant 0 : index
    %c0_7 = arith.constant 0 : index
    %9 = vector.load %arg4[%c0_6, %c0_7] : memref<128x128xbf16, #tpu.memory_space<vmem>>, vector<128x128xbf16>
    tpu.vector_store %arg4[%c0_6, %c0_7], %8 {strides = array<i32>} : memref<128x128xbf16, #tpu.memory_space<vmem>>, vector<128x128xbf16>,
    return
  }
  func.func @transform_0(%arg0: i32) -> (i32, i32) {
    %c0_i32 = arith.constant 0 : i32
    %c0_i32_0 = arith.constant 0 : i32
    return %arg0, %c0_i32 : i32, i32
  }
  func.func @transform_1(%arg0: i32) -> (i32, i32) {
    %c0_i32 = arith.constant 0 : i32
    %c0_i32_0 = arith.constant 0 : i32
    %c0_i32_1 = arith.constant 0 : i32
    return %c0_i32, %c0_i32_0 : i32, i32
  }
  func.func @transform_2(%arg0: i32) -> (i32, i32) {
    %c0_i32 = arith.constant 0 : i32
    %c0_i32_0 = arith.constant 0 : i32
    %c0_i32_1 = arith.constant 0 : i32
    return %c0_i32, %c0_i32_0 : i32, i32
  }
  func.func @transform_3(%arg0: i32) -> (i32, i32) {
    %c0_i32 = arith.constant 0 : i32
    %c0_i32_0 = arith.constant 0 : i32
    return %arg0, %c0_i32 : i32, i32
  }
}

module attributes {stable_mosaic.version = 11 : i64} {
  func.func @_fused_dw_pw_kernel(%arg0: i32, %arg1: i32, %arg2: memref<1x1x2x5x32xbf16, #tpu.memory_space<vmem>>, %arg3: memref<1x1x2x5x32xbf16, #tpu.memory_space<vmem>>, %arg4: memref<1x1x2x5x32xbf16, #tpu.memory_space<vmem>>, %arg5: memref<9x1x32xf32, #tpu.memory_space<vmem>>, %arg6: memref<1x32xf32, #tpu.memory_space<vmem>>, %arg7: memref<32x128xbf16, #tpu.memory_space<vmem>>, %arg8: memref<1x128xf32, #tpu.memory_space<vmem>>, %arg9: memref<1x1x4x128xf32, #tpu.memory_space<vmem>>) attributes {dimension_semantics = [#tpu.dimension_semantics<parallel>, #tpu.dimension_semantics<parallel>], iteration_bounds = array<i64: 2, 4>, scalar_prefetch = 0 : i64, scratch_operands = 0 : i64, tpu.core_type = #tpu.core_type<tc>, window_params = [{transform_indices = @transform_0, window_bounds = array<i64: 1, 1, 2, 5, 32>}, {transform_indices = @transform_1, window_bounds = array<i64: 1, 1, 2, 5, 32>}, {transform_indices = @transform_2, window_bounds = array<i64: 1, 1, 2, 5, 32>}, {pipeline_mode = #tpu.pipeline_mode<synchronous>, transform_indices = @transform_3, window_bounds = array<i64: 9, 1, 32>}, {pipeline_mode = #tpu.pipeline_mode<synchronous>, transform_indices = @transform_4, window_bounds = array<i64: 1, 32>}, {pipeline_mode = #tpu.pipeline_mode<synchronous>, transform_indices = @transform_5, window_bounds = array<i64: 32, 128>}, {pipeline_mode = #tpu.pipeline_mode<synchronous>, transform_indices = @transform_6, window_bounds = array<i64: 1, 128>}, {transform_indices = @transform_7, window_bounds = array<i64: 1, 1, 4, 128>}]} {
    %c0 = arith.constant 0 : index
    %c0_0 = arith.constant 0 : index
    %c0_1 = arith.constant 0 : index
    %c0_2 = arith.constant 0 : index
    %c0_3 = arith.constant 0 : index
    %0 = vector.load %arg2[%c0, %c0_0, %c0_1, %c0_2, %c0_3] : memref<1x1x2x5x32xbf16, #tpu.memory_space<vmem>>, vector<1x1x2x5x32xbf16>
    %1 = vector.shape_cast %0 : vector<1x1x2x5x32xbf16> to vector<2x5x32xbf16>
    %c0_4 = arith.constant 0 : index
    %c0_5 = arith.constant 0 : index
    %c0_6 = arith.constant 0 : index
    %c0_7 = arith.constant 0 : index
    %c0_8 = arith.constant 0 : index
    %2 = vector.load %arg3[%c0_4, %c0_5, %c0_6, %c0_7, %c0_8] : memref<1x1x2x5x32xbf16, #tpu.memory_space<vmem>>, vector<1x1x2x5x32xbf16>
    %3 = vector.shape_cast %2 : vector<1x1x2x5x32xbf16> to vector<2x5x32xbf16>
    %c0_9 = arith.constant 0 : index
    %c0_10 = arith.constant 0 : index
    %c0_11 = arith.constant 0 : index
    %c0_12 = arith.constant 0 : index
    %c0_13 = arith.constant 0 : index
    %4 = vector.load %arg4[%c0_9, %c0_10, %c0_11, %c0_12, %c0_13] : memref<1x1x2x5x32xbf16, #tpu.memory_space<vmem>>, vector<1x1x2x5x32xbf16>
    %5 = vector.shape_cast %4 : vector<1x1x2x5x32xbf16> to vector<2x5x32xbf16>
    %c0_14 = arith.constant 0 : index
    %c0_15 = arith.constant 0 : index
    %c0_16 = arith.constant 0 : index
    %6 = vector.load %arg5[%c0_14, %c0_15, %c0_16] : memref<9x1x32xf32, #tpu.memory_space<vmem>>, vector<9x1x32xf32>
    %cst = arith.constant 0.000000e+00 : f32
    %7 = vector.broadcast %cst : f32 to vector<4x32xf32>
    %8 = vector.extract_strided_slice %1 {offsets = [0, 0, 0], sizes = [1, 4, 32], strides = [1, 1, 1]} : vector<2x5x32xbf16> to vector<1x4x32xbf16>
    %9 = vector.shape_cast %8 : vector<1x4x32xbf16> to vector<4x32xbf16>
    %10 = vector.extract_strided_slice %1 {offsets = [1, 0, 0], sizes = [1, 4, 32], strides = [1, 1, 1]} : vector<2x5x32xbf16> to vector<1x4x32xbf16>
    %11 = vector.shape_cast %10 : vector<1x4x32xbf16> to vector<4x32xbf16>
    %12 = vector.extract_strided_slice %1 {offsets = [0, 1, 0], sizes = [1, 4, 32], strides = [1, 1, 1]} : vector<2x5x32xbf16> to vector<1x4x32xbf16>
    %13 = vector.shape_cast %12 : vector<1x4x32xbf16> to vector<4x32xbf16>
    %14 = arith.extf %9 : vector<4x32xbf16> to vector<4x32xf32>
    %15 = vector.extract_strided_slice %6 {offsets = [0, 0, 0], sizes = [1, 1, 32], strides = [1, 1, 1]} : vector<9x1x32xf32> to vector<1x1x32xf32>
    %16 = vector.shape_cast %15 : vector<1x1x32xf32> to vector<1x32xf32>
    %17 = vector.broadcast %16 : vector<1x32xf32> to vector<4x32xf32>
    %18 = arith.mulf %14, %17 : vector<4x32xf32>
    %19 = arith.addf %7, %18 : vector<4x32xf32>
    %20 = arith.extf %11 : vector<4x32xbf16> to vector<4x32xf32>
    %21 = vector.extract_strided_slice %6 {offsets = [1, 0, 0], sizes = [1, 1, 32], strides = [1, 1, 1]} : vector<9x1x32xf32> to vector<1x1x32xf32>
    %22 = vector.shape_cast %21 : vector<1x1x32xf32> to vector<1x32xf32>
    %23 = vector.broadcast %22 : vector<1x32xf32> to vector<4x32xf32>
    %24 = arith.mulf %20, %23 : vector<4x32xf32>
    %25 = arith.addf %19, %24 : vector<4x32xf32>
    %26 = arith.extf %13 : vector<4x32xbf16> to vector<4x32xf32>
    %27 = vector.extract_strided_slice %6 {offsets = [2, 0, 0], sizes = [1, 1, 32], strides = [1, 1, 1]} : vector<9x1x32xf32> to vector<1x1x32xf32>
    %28 = vector.shape_cast %27 : vector<1x1x32xf32> to vector<1x32xf32>
    %29 = vector.broadcast %28 : vector<1x32xf32> to vector<4x32xf32>
    %30 = arith.mulf %26, %29 : vector<4x32xf32>
    %31 = arith.addf %25, %30 : vector<4x32xf32>
    %32 = vector.extract_strided_slice %3 {offsets = [0, 0, 0], sizes = [1, 4, 32], strides = [1, 1, 1]} : vector<2x5x32xbf16> to vector<1x4x32xbf16>
    %33 = vector.shape_cast %32 : vector<1x4x32xbf16> to vector<4x32xbf16>
    %34 = vector.extract_strided_slice %3 {offsets = [1, 0, 0], sizes = [1, 4, 32], strides = [1, 1, 1]} : vector<2x5x32xbf16> to vector<1x4x32xbf16>
    %35 = vector.shape_cast %34 : vector<1x4x32xbf16> to vector<4x32xbf16>
    %36 = vector.extract_strided_slice %3 {offsets = [0, 1, 0], sizes = [1, 4, 32], strides = [1, 1, 1]} : vector<2x5x32xbf16> to vector<1x4x32xbf16>
    %37 = vector.shape_cast %36 : vector<1x4x32xbf16> to vector<4x32xbf16>
    %38 = arith.extf %33 : vector<4x32xbf16> to vector<4x32xf32>
    %39 = vector.extract_strided_slice %6 {offsets = [3, 0, 0], sizes = [1, 1, 32], strides = [1, 1, 1]} : vector<9x1x32xf32> to vector<1x1x32xf32>
    %40 = vector.shape_cast %39 : vector<1x1x32xf32> to vector<1x32xf32>
    %41 = vector.broadcast %40 : vector<1x32xf32> to vector<4x32xf32>
    %42 = arith.mulf %38, %41 : vector<4x32xf32>
    %43 = arith.addf %31, %42 : vector<4x32xf32>
    %44 = arith.extf %35 : vector<4x32xbf16> to vector<4x32xf32>
    %45 = vector.extract_strided_slice %6 {offsets = [4, 0, 0], sizes = [1, 1, 32], strides = [1, 1, 1]} : vector<9x1x32xf32> to vector<1x1x32xf32>
    %46 = vector.shape_cast %45 : vector<1x1x32xf32> to vector<1x32xf32>
    %47 = vector.broadcast %46 : vector<1x32xf32> to vector<4x32xf32>
    %48 = arith.mulf %44, %47 : vector<4x32xf32>
    %49 = arith.addf %43, %48 : vector<4x32xf32>
    %50 = arith.extf %37 : vector<4x32xbf16> to vector<4x32xf32>
    %51 = vector.extract_strided_slice %6 {offsets = [5, 0, 0], sizes = [1, 1, 32], strides = [1, 1, 1]} : vector<9x1x32xf32> to vector<1x1x32xf32>
    %52 = vector.shape_cast %51 : vector<1x1x32xf32> to vector<1x32xf32>
    %53 = vector.broadcast %52 : vector<1x32xf32> to vector<4x32xf32>
    %54 = arith.mulf %50, %53 : vector<4x32xf32>
    %55 = arith.addf %49, %54 : vector<4x32xf32>
    %56 = vector.extract_strided_slice %5 {offsets = [0, 0, 0], sizes = [1, 4, 32], strides = [1, 1, 1]} : vector<2x5x32xbf16> to vector<1x4x32xbf16>
    %57 = vector.shape_cast %56 : vector<1x4x32xbf16> to vector<4x32xbf16>
    %58 = vector.extract_strided_slice %5 {offsets = [1, 0, 0], sizes = [1, 4, 32], strides = [1, 1, 1]} : vector<2x5x32xbf16> to vector<1x4x32xbf16>
    %59 = vector.shape_cast %58 : vector<1x4x32xbf16> to vector<4x32xbf16>
    %60 = vector.extract_strided_slice %5 {offsets = [0, 1, 0], sizes = [1, 4, 32], strides = [1, 1, 1]} : vector<2x5x32xbf16> to vector<1x4x32xbf16>
    %61 = vector.shape_cast %60 : vector<1x4x32xbf16> to vector<4x32xbf16>
    %62 = arith.extf %57 : vector<4x32xbf16> to vector<4x32xf32>
    %63 = vector.extract_strided_slice %6 {offsets = [6, 0, 0], sizes = [1, 1, 32], strides = [1, 1, 1]} : vector<9x1x32xf32> to vector<1x1x32xf32>
    %64 = vector.shape_cast %63 : vector<1x1x32xf32> to vector<1x32xf32>
    %65 = vector.broadcast %64 : vector<1x32xf32> to vector<4x32xf32>
    %66 = arith.mulf %62, %65 : vector<4x32xf32>
    %67 = arith.addf %55, %66 : vector<4x32xf32>
    %68 = arith.extf %59 : vector<4x32xbf16> to vector<4x32xf32>
    %69 = vector.extract_strided_slice %6 {offsets = [7, 0, 0], sizes = [1, 1, 32], strides = [1, 1, 1]} : vector<9x1x32xf32> to vector<1x1x32xf32>
    %70 = vector.shape_cast %69 : vector<1x1x32xf32> to vector<1x32xf32>
    %71 = vector.broadcast %70 : vector<1x32xf32> to vector<4x32xf32>
    %72 = arith.mulf %68, %71 : vector<4x32xf32>
    %73 = arith.addf %67, %72 : vector<4x32xf32>
    %74 = arith.extf %61 : vector<4x32xbf16> to vector<4x32xf32>
    %75 = vector.extract_strided_slice %6 {offsets = [8, 0, 0], sizes = [1, 1, 32], strides = [1, 1, 1]} : vector<9x1x32xf32> to vector<1x1x32xf32>
    %76 = vector.shape_cast %75 : vector<1x1x32xf32> to vector<1x32xf32>
    %77 = vector.broadcast %76 : vector<1x32xf32> to vector<4x32xf32>
    %78 = arith.mulf %74, %77 : vector<4x32xf32>
    %79 = arith.addf %73, %78 : vector<4x32xf32>
    %c0_17 = arith.constant 0 : index
    %c0_18 = arith.constant 0 : index
    %80 = vector.load %arg6[%c0_17, %c0_18] : memref<1x32xf32, #tpu.memory_space<vmem>>, vector<1x32xf32>
    %81 = vector.broadcast %80 : vector<1x32xf32> to vector<4x32xf32>
    %82 = arith.addf %79, %81 : vector<4x32xf32>
    %cst_19 = arith.constant 0.000000e+00 : f32
    %83 = vector.broadcast %cst_19 : f32 to vector<4x32xf32>
    %84 = arith.maximumf %82, %83 : vector<4x32xf32>
    %85 = arith.truncf %84 : vector<4x32xf32> to vector<4x32xbf16>
    %c0_20 = arith.constant 0 : index
    %c0_21 = arith.constant 0 : index
    %86 = vector.load %arg7[%c0_20, %c0_21] : memref<32x128xbf16, #tpu.memory_space<vmem>>, vector<32x128xbf16>
    %cst_22 = arith.constant dense<0.000000e+00> : vector<4x128xf32>
    %87 = tpu.matmul %85, %86, %cst_22 {dimension_numbers = #tpu.dot_dimension_numbers<[1], [0], [0], [1], [0, 0, 1, 1], [], []>} : vector<4x32xbf16>, vector<32x128xbf16>, vector<4x128xf32> -> vector<4x128xf32>
    %c0_23 = arith.constant 0 : index
    %c0_24 = arith.constant 0 : index
    %88 = vector.load %arg8[%c0_23, %c0_24] : memref<1x128xf32, #tpu.memory_space<vmem>>, vector<1x128xf32>
    %89 = vector.broadcast %88 : vector<1x128xf32> to vector<4x128xf32>
    %90 = arith.addf %87, %89 : vector<4x128xf32>
    %cst_25 = arith.constant 0.000000e+00 : f32
    %91 = vector.broadcast %cst_25 : f32 to vector<4x128xf32>
    %92 = arith.maximumf %90, %91 : vector<4x128xf32>
    %93 = vector.shape_cast %92 : vector<4x128xf32> to vector<1x1x4x128xf32>
    %c0_26 = arith.constant 0 : index
    %c0_27 = arith.constant 0 : index
    %c0_28 = arith.constant 0 : index
    %c0_29 = arith.constant 0 : index
    %94 = vector.load %arg9[%c0_26, %c0_27, %c0_28, %c0_29] : memref<1x1x4x128xf32, #tpu.memory_space<vmem>>, vector<1x1x4x128xf32>
    tpu.vector_store %arg9[%c0_26, %c0_27, %c0_28, %c0_29], %93 {strides = array<i32>} : memref<1x1x4x128xf32, #tpu.memory_space<vmem>>, vector<1x1x4x128xf32>,
    return
  }
  func.func @transform_0(%arg0: i32, %arg1: i32) -> (i32, i32, i32, i32, i32) {
    %c2_i32 = arith.constant 2 : i32
    %0 = arith.muli %c2_i32, %arg1 : i32
    %c0_i32 = arith.constant 0 : i32
    %1 = arith.addi %0, %c0_i32 : i32
    %c0_i32_0 = arith.constant 0 : i32
    %c0_i32_1 = arith.constant 0 : i32
    %c0_i32_2 = arith.constant 0 : i32
    %c0_i32_3 = arith.constant 0 : i32
    return %arg0, %1, %c0_i32_0, %c0_i32_1, %c0_i32_2 : i32, i32, i32, i32, i32
  }
  func.func @transform_1(%arg0: i32, %arg1: i32) -> (i32, i32, i32, i32, i32) {
    %c2_i32 = arith.constant 2 : i32
    %0 = arith.muli %c2_i32, %arg1 : i32
    %c1_i32 = arith.constant 1 : i32
    %1 = arith.addi %0, %c1_i32 : i32
    %c0_i32 = arith.constant 0 : i32
    %c0_i32_0 = arith.constant 0 : i32
    %c0_i32_1 = arith.constant 0 : i32
    %c0_i32_2 = arith.constant 0 : i32
    return %arg0, %1, %c0_i32, %c0_i32_0, %c0_i32_1 : i32, i32, i32, i32, i32
  }
  func.func @transform_2(%arg0: i32, %arg1: i32) -> (i32, i32, i32, i32, i32) {
    %c2_i32 = arith.constant 2 : i32
    %0 = arith.muli %c2_i32, %arg1 : i32
    %c2_i32_0 = arith.constant 2 : i32
    %1 = arith.addi %0, %c2_i32_0 : i32
    %c0_i32 = arith.constant 0 : i32
    %c0_i32_1 = arith.constant 0 : i32
    %c0_i32_2 = arith.constant 0 : i32
    %c0_i32_3 = arith.constant 0 : i32
    return %arg0, %1, %c0_i32, %c0_i32_1, %c0_i32_2 : i32, i32, i32, i32, i32
  }
  func.func @transform_3(%arg0: i32, %arg1: i32) -> (i32, i32, i32) {
    %c0_i32 = arith.constant 0 : i32
    %c0_i32_0 = arith.constant 0 : i32
    %c0_i32_1 = arith.constant 0 : i32
    %c0_i32_2 = arith.constant 0 : i32
    return %c0_i32, %c0_i32_0, %c0_i32_1 : i32, i32, i32
  }
  func.func @transform_4(%arg0: i32, %arg1: i32) -> (i32, i32) {
    %c0_i32 = arith.constant 0 : i32
    %c0_i32_0 = arith.constant 0 : i32
    %c0_i32_1 = arith.constant 0 : i32
    return %c0_i32, %c0_i32_0 : i32, i32
  }
  func.func @transform_5(%arg0: i32, %arg1: i32) -> (i32, i32) {
    %c0_i32 = arith.constant 0 : i32
    %c0_i32_0 = arith.constant 0 : i32
    %c0_i32_1 = arith.constant 0 : i32
    return %c0_i32, %c0_i32_0 : i32, i32
  }
  func.func @transform_6(%arg0: i32, %arg1: i32) -> (i32, i32) {
    %c0_i32 = arith.constant 0 : i32
    %c0_i32_0 = arith.constant 0 : i32
    %c0_i32_1 = arith.constant 0 : i32
    return %c0_i32, %c0_i32_0 : i32, i32
  }
  func.func @transform_7(%arg0: i32, %arg1: i32) -> (i32, i32, i32, i32) {
    %c0_i32 = arith.constant 0 : i32
    %c0_i32_0 = arith.constant 0 : i32
    %c0_i32_1 = arith.constant 0 : i32
    return %arg0, %arg1, %c0_i32, %c0_i32_0 : i32, i32, i32, i32
  }
}

</mosaic_0001>

<bundles_post_ra>
// kernel: forward.4
= control target key start
LH: loop header
LB: loop body
LE: loop exit
PB: predicated region body
PF: predicated region fallthrough
CT: control target
= control target key end

     0   :  { %s828_s24 = smov 0   ;;  %s830_s25 = smov 0   ;;  %s939_s0 = inlined_call_operand.vmem [shape: bf16[2,10,1,10,16], index: 0, kind: input, shape index: {}, may-alias: {0,1,2}]   ;;  %s940_s1 = inlined_call_operand.vmem [shape: bf16[2,10,1,10,16], index: 1, kind: input, shape index: {}, may-alias: {0,1,2}]   ;;  %s941_s2 = inlined_call_operand.vmem [shape: bf16[2,10,1,10,16], index: 2, kind: input, shape index: {}, may-alias: {0,1,2}]   ;;  %s942_s3 = inlined_call_operand.vmem [shape: f32[9,1,16], index: 3, kind: input, shape index: {}]   ;;  %s943_s4 = inlined_call_operand.vmem [shape: f32[1,16], index: 4, kind: input, shape index: {}]   ;;  %s944_s5 = inlined_call_operand.vmem [shape: bf16[16,128], index: 5, kind: input, shape index: {}]   ;;  %s945_s6 = inlined_call_operand.vmem [shape: f32[1,128], index: 6, kind: input, shape index: {}]   ;;  %s946_s7 = inlined_call_operand.vmem [shape: f32[2,8,8,128], index: 7, kind: output, shape index: {}]  }
   0x1   :  { %s832_s26 = smov 0   ;;  %s834_s27 = smov 0  }
   0x2   :  { %s836_s28 = smov 0  }
   0x3 LB: > { %s26_s29 = sadd.s32 1, %s778_s26  ;;  %s29_s30 = sadd.s32 1, %s782_s27  ;;  %s786_s28 = sphi %s836_s28, %s17_s28   ;;  %s782_s27 = sphi %s834_s27, %s950_s27   ;;  %s778_s26 = sphi %s832_s26, %s949_s26   ;;  %s774_s25 = sphi %s830_s25, %s948_s25   ;;  %s770_s24 = sphi %s828_s24, %s947_s24  }
   0x4   : > { %p27_p0 = scmp.ge.s32.totalorder %s26_s29, 8  ;;  %p679_p1 = scmp.ge.s32.totalorder %s786_s28, 1 }
   0x5   : > { %p297_p2 = scmp.lt.s32.totalorder %s786_s28, 17 }
   0x6   : > { %s952_s29 = smov (%p27_p0, %s26_s29), 0  ;;  %s954_s30 = smov (!%p27_p0, %s29_s30), %s782_s27 }
   0x7   : > { %p298_p3 = pnand %p679_p1, %p297_p2  ;;  %p31_p4 = scmp.ge.s32.totalorder %s954_s30, 2 }
   0x8   : > { %p356_p5 = scmp.lt.s32.totalorder (!%p298_p3), %s774_s25, 1  ;;  %p358_p6 = scmp.lt.s32.totalorder (!%p298_p3), %s770_s24, 9 }
   0x9   : > { %s956_s30 = smov (%p31_p4, %s954_s30), 0  ;;  %301 = sbr.rel (%p298_p3) target bundleno = 185 (0xb9), region = 48 }
   0xa   : > { %s365_s10 = sadd.s32 (!%p298_p3), 1, %s770_s24  ;;  %s376_s11 = sadd.s32 (!%p298_p3), 2, %s770_s24 }
   0xb   : > { %p368_p7 = scmp.lt.s32.totalorder (!%p298_p3), %s365_s10, 9  ;;  %p379_p8 = scmp.lt.s32.totalorder (!%p298_p3), %s376_s11, 9 }
   0xc   : > { %p389_p9 = scmp.lt.s32.totalorder (!%p298_p3), %s770_s24, 7 }
   0xe   : > { %v695_v0 = vld [vmem:[%s944_s5] sm:$0xff]  ;;  %s958_s25 = smov (!%p356_p5, %s774_s25), 1  ;;  %s960_s10 = smov (!%p368_p7, %s365_s10), 9  ;;  %vm425_vm0 = vcmask 1046528   ;;  %vm438_vm1 = vcmask 1045504   ;;  %vm525_vm2 = vcmask 130048  }
   0xf   : > { %536 = vmatpush.bf16.msra.mxu0 %v695_v0  ;;  %s359_s12 = scalar_select %p358_p6, %s770_s24, 9  ;;  %v737_v1 = vld [vmem:[%s942_s3] ss:$0 sm:$0xff]  ;;  %v738_v2 = vld [vmem:[%s942_s3 + $0x1] ss:$0 sm:$0xff] }
  0x10   : > { %s696_s13 = smul.u32 20, %s958_s25  ;;  %v739_v3 = vld [vmem:[%s942_s3 + $0x2] ss:$0 sm:$0xff]  ;;  %s962_s11 = smov (!%p379_p8, %s376_s11), 9  ;;  %v740_v11 = vld [vmem:[%s942_s3 + $0x3] ss:$0 sm:$0xff] }
  0x11   : > { %s680_s14 = sshll.u32 %s359_s12, 1  ;;  %s682_s12 = sshll.u32 %s960_s10, 1  ;;  %v741_v14 = vld [vmem:[%s942_s3 + $0x4] ss:$0 sm:$0xff]  ;;  %v742_v15 = vld [vmem:[%s942_s3 + $0x5] ss:$0 sm:$0xff] }
  0x12   : > { %s362_s15 = sadd.s32 %s696_s13, %s680_s14  ;;  %s372_s14 = sadd.s32 %s696_s13, %s682_s12  ;;  %v744_v19 = vld [vmem:[%s942_s3 + $0x7] ss:$0 sm:$0xff]  ;;  %v745_v32 = vld [vmem:[%s942_s3 + $0x8] ss:$0 sm:$0xff]  ;;  %v743_v39 = vld [vmem:[%s942_s3 + $0x6] ss:$0 sm:$0xff] }
  0x13   : > { %s681_s16 = sshll.u32 %s362_s15, 2  ;;  %s684_s15 = sshll.u32 %s962_s11, 1  ;;  %v746_v62 = vld [vmem:[%s943_s4] ss:$0 sm:$0xff] }
  0x14   : > { %s364_s21 = scalar_lea.vmem %s939_s0, %s681_s16  ;;  %s683_s18 = sshll.u32 %s372_s14, 2 }
  0x15   : > { %v396_v4 = vld [vmem:[%s364_s21] sm:$0xf]  ;;  %v397_v5 = vld [vmem:[%s364_s21 + $0x4] sm:$0x1]  ;;  %s383_s19 = sadd.s32 %s696_s13, %s684_s15  ;;  %s374_s8 = scalar_lea.vmem %s940_s1, %s683_s18 }
  0x16   : > { %v411_v6 = vunpack.c.l.bf16 %v396_v4  ;;  %v417_v7 = vunpack.c.l.bf16 %v397_v5  ;;  %s685_s9 = sshll.u32 %s383_s19, 2  ;;  %v398_v20 = vld [vmem:[%s374_s8] sm:$0xf]  ;;  %v399_v21 = vld [vmem:[%s374_s8 + $0x4] sm:$0x1]  ;;  %s964_s24 = smov (!%p389_p9, %s770_s24), 7 }
  0x17   : > { %s385_s16 = scalar_lea.vmem %s941_s2, %s685_s9  ;;  %v444_v26 = vunpack.c.l.bf16 %v398_v20  ;;  %v450_v27 = vunpack.c.l.bf16 %v399_v21  ;;  %s686_s22 = sshll.u32 %s958_s25, 3 }
  0x18   : > { %v421_v8 = vmul.f32 %v738_v2, %v411_v6  ;;  %v422_v9 = vmul.f32 %v738_v2, %v417_v7  ;;  %v434_v10 = vmul.f32 %v739_v3, %v411_v6  ;;  %v415_v12 = vmul.f32 %v737_v1, %v411_v6  ;;  %v400_v23 = vld [vmem:[%s385_s16] sm:$0xf]  ;;  %v401_v24 = vld [vmem:[%s385_s16 + $0x4] sm:$0x1]  ;;  %s392_s11 = sadd.s32 %s686_s22, %s964_s24 }
  0x19   : > { %v435_v13 = vmul.f32 %v739_v3, %v417_v7  ;;  %v475_v30 = vunpack.c.l.bf16 %v400_v23  ;;  %v481_v31 = vunpack.c.l.bf16 %v401_v24  ;;  %v448_v33 = vmul.f32 %v740_v11, %v444_v26  ;;  %v747_v3 = vld [vmem:[%s945_s6] ss:$0 sm:$0xff]  ;;  %s687_s9 = sshll.u32 %s392_s11, 3 }
  0x1a   : > { %v426_v16 = vrot.slane %v421_v8, 1  ;;  %v427_v17 = vrot.slane %v422_v9, 1  ;;  %v439_v18 = vrot.slane %v434_v10, 2  ;;  %v454_v34 = vmul.f32 %v741_v14, %v444_v26  ;;  %s394_s14 = scalar_lea.vmem %s946_s7, %s687_s9 }
  0x1b   : > { %v440_v22 = vrot.slane %v435_v13, 2  ;;  %v455_v35 = vmul.f32 %v741_v14, %v450_v27  ;;  %v466_v36 = vmul.f32 %v742_v15, %v444_v26  ;;  %v467_v38 = vmul.f32 %v742_v15, %v450_v27 }
  0x1c   : > { %v428_v25 = vsel %vm425_vm0, %v426_v16, %v427_v17  ;;  %v485_v40 = vmul.f32 %v744_v19, %v475_v30  ;;  %v458_v41 = vrot.slane %v454_v34, 1  ;;  %v486_v44 = vmul.f32 %v744_v19, %v481_v31 }
  0x1d   : > { %v430_v28 = vadd.f32 %v428_v25, %v415_v12  ;;  %v441_v29 = vsel %vm438_vm1, %v439_v18, %v440_v22  ;;  %v459_v42 = vrot.slane %v455_v35, 1  ;;  %v470_v43 = vrot.slane %v466_v36, 2 }
  0x1e   : > { %v471_v46 = vrot.slane %v467_v38, 2  ;;  %v497_v47 = vmul.f32 %v745_v32, %v475_v30  ;;  %v489_v49 = vrot.slane %v485_v40, 1  ;;  %v490_v50 = vrot.slane %v486_v44, 1 }
  0x1f   : > { %v443_v37 = vadd.f32 %v441_v29, %v430_v28  ;;  %v460_v48 = vsel %vm425_vm0, %v458_v41, %v459_v42  ;;  %v498_v51 = vmul.f32 %v745_v32, %v481_v31  ;;  %v479_v54 = vmul.f32 %v743_v39, %v475_v30 }
  0x20   : > { %v472_v53 = vsel %vm438_vm1, %v470_v43, %v471_v46  ;;  %v501_v55 = vrot.slane %v497_v47, 2  ;;  %v491_v58 = vsel %vm425_vm0, %v489_v49, %v490_v50 }
  0x21   : > { %v449_v45 = vadd.f32 %v448_v33, %v443_v37  ;;  %v502_v56 = vrot.slane %v498_v51, 2 }
  0x23   : > { %v462_v52 = vadd.f32 %v460_v48, %v449_v45  ;;  %v503_v60 = vsel %vm438_vm1, %v501_v55, %v502_v56 }
  0x25   : > { %v474_v57 = vadd.f32 %v472_v53, %v462_v52 }
  0x27   : > { %v480_v59 = vadd.f32 %v479_v54, %v474_v57 }
  0x29   : > { %v493_v61 = vadd.f32 %v491_v58, %v480_v59 }
  0x2b   : > { %v505_v63 = vadd.f32 %v503_v60, %v493_v61 }
  0x2d   : > { %v510_v0 = vadd.f32 %v746_v62, %v505_v63 }
  0x2f   : > { %v511_v1 = vmax.f32 %v510_v0, 0.0 }
  0x31   : > { %v512_v2 = vpack.c.bf16 %v511_v1, %v511_v1 }
  0x33   : > { %692 = vmatmul.msk.bf16.vlgmr.msra.gmra.mxu0 %vm525_vm2, %v512_v2 }
  0xb0   : > { %v538_v4 = vpop.f32.mrf.mxu0 }
  0xb1   : > { %v539_v5 = vadd.f32 %v747_v3, %v538_v4 }
  0xb3   : > { %v542_v6 = vmax.f32 %v539_v5, 0.0 }
  0xb5   : > { %543 = vst [vmem:[%s394_s14] sm:$0xff] %v542_v6 }
  0xb8   : > { %v540_v7 = vpop.f32.mrf.mxu0 }
  0xb9 PF: > { %s17_s28 = sadd.s32 1, %s786_s28   ;;  %s947_s24 = smov %s778_s26 }
  0xba   : > { %p14_p10 = scmp.ge.s32.totalorder %s17_s28, 18   ;;  %s948_s25 = smov %s782_s27 }
  0xbb   : > { %s949_s26 = smov %s952_s29  ;;  %s950_s27 = smov %s956_s30 }
  0xbc   :  { %16 = sbr.rel (!%p14_p10) target bundleno = 3 (0x3), region = 84 }

// kernel: forward.3
= control target key start
LH: loop header
LB: loop body
LE: loop exit
PB: predicated region body
PF: predicated region fallthrough
CT: control target
= control target key end

     0   :  { %vm91_vm0 = vcmask 261120   ;;  %s414_s1 = inlined_call_operand.vmem [shape: bf16[32,128], index: 1, kind: input, shape index: {}]   ;;  %s415_s0 = inlined_call_operand.vmem [shape: bf16[128,32], index: 0, kind: input, shape index: {}]   ;;  %s416_s2 = inlined_call_operand.vmem [shape: f32[1,128], index: 2, kind: input, shape index: {}]   ;;  %s417_s3 = inlined_call_operand.vmem [shape: bf16[128,128], index: 3, kind: output, shape index: {}]  }
   0x1   :  { %v274_v0 = vld [vmem:[%s414_s1 + $0x8] sm:$0xff]  ;;  %v273_v1 = vld [vmem:[%s414_s1] sm:$0xff]  ;;  %v267_v3 = vld [vmem:[%s415_s0 + $0x10] sm:$0xff] }
   0x2   :  { %122 = vmatpush.bf16.msra.mxu0 %v274_v0  ;;  %322 = vmatpush.bf16.msra.mxu1 %v274_v0  ;;  %v265_v2 = vld [vmem:[%s415_s0] sm:$0xff]  ;;  %v271_v5 = vld [vmem:[%s415_s0 + $0x30] sm:$0xff]  ;;  %v266_v6 = vld [vmem:[%s415_s0 + $0x8] sm:$0xff] }
   0x3   :  { %323 = vmatpush.bf16.msra.mxu2 %v274_v0  ;;  %324 = vmatpush.bf16.msra.mxu3 %v274_v0  ;;  %v269_v4 = vld [vmem:[%s415_s0 + $0x20] sm:$0xff]  ;;  %v268_v7 = vld [vmem:[%s415_s0 + $0x18] sm:$0xff]  ;;  %v270_v8 = vld [vmem:[%s415_s0 + $0x28] sm:$0xff] }
   0x4   :  { %v272_v9 = vld [vmem:[%s415_s0 + $0x38] sm:$0xff]  ;;  %v328_v12 = vld [vmem:[%s416_s2] ss:$0 sm:$0xff] }
   0x6   :  { %123 = vmatpush.bf16.msra.mxu0 %v273_v1  ;;  %325 = vmatpush.bf16.msra.mxu1 %v273_v1 }
   0x7   :  { %326 = vmatpush.bf16.msra.mxu2 %v273_v1  ;;  %327 = vmatpush.bf16.msra.mxu3 %v273_v1 }
   0x9   :  { %257 = vmatmul.msk.bf16.vlgmr.msra.gmra.mxu0 %vm91_vm0, %v265_v2  ;;  %259 = vmatmul.msk.bf16.vlgmr.msra.gmra.mxu1 %vm91_vm0, %v267_v3 }
   0xa   :  { %261 = vmatmul.msk.bf16.vlgmr.msra.gmra.mxu2 %vm91_vm0, %v269_v4  ;;  %263 = vmatmul.msk.bf16.vlgmr.msra.gmra.mxu3 %vm91_vm0, %v271_v5 }
  0x19   :  { %258 = vmatmul.msk.bf16.gmra.mxu0 %vm91_vm0, %v266_v6  ;;  %260 = vmatmul.msk.bf16.gmra.mxu1 %vm91_vm0, %v268_v7 }
  0x1a   :  { %262 = vmatmul.msk.bf16.gmra.mxu2 %vm91_vm0, %v270_v8  ;;  %264 = vmatmul.msk.bf16.gmra.mxu3 %vm91_vm0, %v272_v9 }
  0x86   :  { %v125_v10 = vpop.f32.mrf.mxu0  ;;  %v135_v11 = vpop.f32.mrf.mxu1 }
  0x87   :  { %v126_v13 = vadd.f32 %v328_v12, %v125_v10  ;;  %v136_v14 = vadd.f32 %v328_v12, %v135_v11 }
  0x89   :  { %v165_v21 = vmax.f32 %v126_v13, 0.0  ;;  %v169_v22 = vmax.f32 %v136_v14, 0.0 }
  0x8d   :  { %v145_v15 = vpop.f32.mrf.mxu2  ;;  %v155_v16 = vpop.f32.mrf.mxu3 }
  0x8e   :  { %v127_v17 = vpop.f32.mrf.mxu0  ;;  %v137_v18 = vpop.f32.mrf.mxu1  ;;  %v146_v27 = vadd.f32 %v328_v12, %v145_v15  ;;  %v156_v28 = vadd.f32 %v328_v12, %v155_v16 }
  0x8f   :  { %v128_v19 = vadd.f32 %v328_v12, %v127_v17  ;;  %v138_v20 = vadd.f32 %v328_v12, %v137_v18 }
  0x90   :  { %v173_v35 = vmax.f32 %v146_v27, 0.0  ;;  %v177_v36 = vmax.f32 %v156_v28, 0.0 }
  0x91   :  { %v166_v23 = vmax.f32 %v128_v19, 0.0  ;;  %v170_v24 = vmax.f32 %v138_v20, 0.0 }
  0x93   :  { %v278_v25 = vpack.c.bf16 %v166_v23, %v165_v21  ;;  %v288_v26 = vpack.c.bf16 %v170_v24, %v169_v22 }
  0x95   :  { %279 = vst [vmem:[%s417_s3] sm:$0xff] %v278_v25   ;;  %v147_v29 = vpop.f32.mrf.mxu2  ;;  %v157_v30 = vpop.f32.mrf.mxu3 }
  0x96   :  { %316 = vst [vmem:[%s417_s3 + $0x10] sm:$0xff] %v288_v26   ;;  %v148_v31 = vadd.f32 %v328_v12, %v147_v29  ;;  %v158_v32 = vadd.f32 %v328_v12, %v157_v30  ;;  %v130_v33 = vpop.f32.mrf.mxu0  ;;  %v140_v34 = vpop.f32.mrf.mxu1 }
  0x97   :  { %v131_v41 = vadd.f32 %v328_v12, %v130_v33  ;;  %v141_v42 = vadd.f32 %v328_v12, %v140_v34 }
  0x98   :  { %v174_v37 = vmax.f32 %v148_v31, 0.0  ;;  %v178_v38 = vmax.f32 %v158_v32, 0.0 }
  0x99   :  { %v167_v49 = vmax.f32 %v131_v41, 0.0  ;;  %v171_v50 = vmax.f32 %v141_v42, 0.0 }
  0x9a   :  { %v298_v39 = vpack.c.bf16 %v174_v37, %v173_v35  ;;  %v308_v40 = vpack.c.bf16 %v178_v38, %v177_v36 }
  0x9c   :  { %318 = vst [vmem:[%s417_s3 + $0x20] sm:$0xff] %v298_v39  }
  0x9d   :  { %320 = vst [vmem:[%s417_s3 + $0x30] sm:$0xff] %v308_v40   ;;  %v150_v43 = vpop.f32.mrf.mxu2  ;;  %v160_v44 = vpop.f32.mrf.mxu3 }
  0x9e   :  { %v132_v45 = vpop.f32.mrf.mxu0  ;;  %v142_v46 = vpop.f32.mrf.mxu1  ;;  %v151_v55 = vadd.f32 %v328_v12, %v150_v43  ;;  %v161_v56 = vadd.f32 %v328_v12, %v160_v44 }
  0x9f   :  { %v133_v47 = vadd.f32 %v328_v12, %v132_v45  ;;  %v143_v48 = vadd.f32 %v328_v12, %v142_v46 }
  0xa0   :  { %v175_v61 = vmax.f32 %v151_v55, 0.0  ;;  %v179_v62 = vmax.f32 %v161_v56, 0.0 }
  0xa1   :  { %v168_v51 = vmax.f32 %v133_v47, 0.0  ;;  %v172_v52 = vmax.f32 %v143_v48, 0.0 }
  0xa3   :  { %v283_v53 = vpack.c.bf16 %v168_v51, %v167_v49  ;;  %v293_v54 = vpack.c.bf16 %v172_v52, %v171_v50 }
  0xa5   :  { %315 = vst [vmem:[%s417_s3 + $0x8] sm:$0xff] %v283_v53   ;;  %v152_v57 = vpop.f32.mrf.mxu2  ;;  %v162_v58 = vpop.f32.mrf.mxu3 }
  0xa6   :  { %317 = vst [vmem:[%s417_s3 + $0x18] sm:$0xff] %v293_v54   ;;  %v153_v59 = vadd.f32 %v328_v12, %v152_v57  ;;  %v163_v60 = vadd.f32 %v328_v12, %v162_v58 }
  0xa8   :  { %v176_v63 = vmax.f32 %v153_v59, 0.0  ;;  %v180_v0 = vmax.f32 %v163_v60, 0.0 }
  0xaa   :  { %v303_v1 = vpack.c.bf16 %v176_v63, %v175_v61  ;;  %v313_v2 = vpack.c.bf16 %v180_v0, %v179_v62 }
  0xac   :  { %319 = vst [vmem:[%s417_s3 + $0x28] sm:$0xff] %v303_v1  }
  0xad   :  { %321 = vst [vmem:[%s417_s3 + $0x38] sm:$0xff] %v313_v2  }

// kernel: forward.5
= control target key start
LH: loop header
LB: loop body
LE: loop exit
PB: predicated region body
PF: predicated region fallthrough
CT: control target
= control target key end

     0   :  { %s836_s24 = smov 0   ;;  %s838_s25 = smov 0   ;;  %s941_s0 = inlined_call_operand.vmem [shape: bf16[2,10,2,5,32], index: 0, kind: input, shape index: {}, may-alias: {0,1,2}]   ;;  %s942_s1 = inlined_call_operand.vmem [shape: bf16[2,10,2,5,32], index: 1, kind: input, shape index: {}, may-alias: {0,1,2}]   ;;  %s943_s2 = inlined_call_operand.vmem [shape: bf16[2,10,2,5,32], index: 2, kind: input, shape index: {}, may-alias: {0,1,2}]   ;;  %s944_s3 = inlined_call_operand.vmem [shape: f32[9,1,32], index: 3, kind: input, shape index: {}]   ;;  %s945_s4 = inlined_call_operand.vmem [shape: f32[1,32], index: 4, kind: input, shape index: {}]   ;;  %s946_s5 = inlined_call_operand.vmem [shape: bf16[32,128], index: 5, kind: input, shape index: {}]   ;;  %s947_s6 = inlined_call_operand.vmem [shape: f32[1,128], index: 6, kind: input, shape index: {}]   ;;  %s948_s7 = inlined_call_operand.vmem [shape: f32[2,4,4,128], index: 7, kind: output, shape index: {}]  }
   0x1   :  { %949 = sst [smem:[#allocation2_spill]] %s946_s5  ;;  %s840_s26 = smov 0  }
   0x2   :  { %s842_s27 = smov 0   ;;  %s844_s28 = smov 0  }
   0x3 LB: > { %s26_s29 = sadd.s32 1, %s786_s26  ;;  %s29_s30 = sadd.s32 1, %s790_s27  ;;  %s794_s28 = sphi %s844_s28, %s17_s28   ;;  %s790_s27 = sphi %s842_s27, %s954_s27   ;;  %s786_s26 = sphi %s840_s26, %s953_s26   ;;  %s782_s25 = sphi %s838_s25, %s952_s25   ;;  %s778_s24 = sphi %s836_s24, %s951_s24  }
   0x4   : > { %p27_p0 = scmp.ge.s32.totalorder %s26_s29, 4  ;;  %p679_p1 = scmp.ge.s32.totalorder %s794_s28, 1 }
   0x5   : > { %p309_p2 = scmp.lt.s32.totalorder %s794_s28, 9 }
   0x6   : > { %s956_s29 = smov (%p27_p0, %s26_s29), 0  ;;  %s958_s30 = smov (!%p27_p0, %s29_s30), %s790_s27 }
   0x7   : > { %p310_p3 = pnand %p679_p1, %p309_p2  ;;  %p31_p4 = scmp.ge.s32.totalorder %s958_s30, 2 }
   0x8   : > { %s950_s5 = sld [smem:[#allocation2_spill]] (!%p310_p3)  ;;  %s680_s10 = sshll.u32 (!%p310_p3), %s778_s24, 1 }
   0x9   : > { %s960_s30 = smov (%p31_p4, %s958_s30), 0  ;;  %313 = sbr.rel (%p310_p3) target bundleno = 182 (0xb6), region = 48 }
   0xa   : > { %p372_p5 = scmp.lt.s32.totalorder (!%p310_p3), %s782_s25, 1  ;;  %p374_p6 = scmp.lt.s32.totalorder (!%p310_p3), %s680_s10, 9 }
   0xb   : > { %s383_s11 = sadd.s32 (!%p310_p3), 1, %s680_s10  ;;  %s396_s17 = sadd.s32 (!%p310_p3), 2, %s680_s10 }
   0xc   : > { %p386_p7 = scmp.lt.s32.totalorder (!%p310_p3), %s383_s11, 9  ;;  %p399_p8 = scmp.lt.s32.totalorder (!%p310_p3), %s396_s17, 9 }
   0xd   : > { %p410_p9 = scmp.lt.s32.totalorder (!%p310_p3), %s778_s24, 3 }
   0xe   : > { %v703_v0 = vld [vmem:[%s950_s5 + $0x8] sm:$0xff]  ;;  %v702_v1 = vld [vmem:[%s950_s5] sm:$0xff]  ;;  %s962_s25 = smov (!%p372_p5, %s782_s25), 1  ;;  %s964_s11 = smov (!%p386_p7, %s383_s11), 9  ;;  %vm519_vm0 = vcmask 261120  }
   0xf   : > { %529 = vmatpush.bf16.msra.mxu0 %v703_v0  ;;  %s375_s14 = scalar_select %p374_p6, %s680_s10, 9  ;;  %v745_v2 = vld [vmem:[%s944_s3] ss:$0 sm:$0xff]  ;;  %v746_v3 = vld [vmem:[%s944_s3 + $0x1] ss:$0 sm:$0xff] }
  0x10   : > { %s704_s15 = smul.u32 20, %s962_s25  ;;  %v747_v4 = vld [vmem:[%s944_s3 + $0x2] ss:$0 sm:$0xff]  ;;  %s966_s17 = smov (!%p399_p8, %s396_s17), 9  ;;  %v748_v12 = vld [vmem:[%s944_s3 + $0x3] ss:$0 sm:$0xff] }
  0x11   : > { %s681_s16 = sshll.u32 %s375_s14, 1  ;;  %s684_s10 = sshll.u32 %s964_s11, 1  ;;  %v749_v15 = vld [vmem:[%s944_s3 + $0x4] ss:$0 sm:$0xff]  ;;  %v750_v16 = vld [vmem:[%s944_s3 + $0x5] ss:$0 sm:$0xff] }
  0x12   : > { %s378_s18 = sadd.s32 %s704_s15, %s681_s16  ;;  %s390_s14 = sadd.s32 %s704_s15, %s684_s10  ;;  %v751_v28 = vld [vmem:[%s944_s3 + $0x6] ss:$0 sm:$0xff]  ;;  %v753_v29 = vld [vmem:[%s944_s3 + $0x8] ss:$0 sm:$0xff]  ;;  %v752_v33 = vld [vmem:[%s944_s3 + $0x7] ss:$0 sm:$0xff] }
  0x13   : > { %530 = vmatpush.bf16.msra.mxu0 %v702_v1  ;;  %s682_s19 = sshll.u32 %s378_s18, 2  ;;  %s687_s16 = sshll.u32 %s966_s17, 1  ;;  %v754_v42 = vld [vmem:[%s945_s4] ss:$0 sm:$0xff] }
  0x14   : > { %s380_s22 = scalar_lea.vmem %s941_s0, %s682_s19  ;;  %s685_s18 = sshll.u32 %s390_s14, 2  ;;  %v755_v47 = vld [vmem:[%s947_s6] ss:$0 sm:$0xff] }
  0x15   : > { %v417_v5 = vld [vmem:[%s380_s22] sm:$0x7]  ;;  %v418_v6 = vld [vmem:[%s380_s22 + $0x4] sm:$0x7]  ;;  %s403_s19 = sadd.s32 %s704_s15, %s687_s16  ;;  %s392_s8 = scalar_lea.vmem %s942_s1, %s685_s18 }
  0x16   : > { %v432_v7 = vunpack.c.l.bf16 %v417_v5  ;;  %v438_v8 = vunpack.c.l.bf16 %v418_v6  ;;  %s688_s22 = sshll.u32 %s403_s19, 2  ;;  %v419_v17 = vld [vmem:[%s392_s8] sm:$0x7]  ;;  %v420_v18 = vld [vmem:[%s392_s8 + $0x4] sm:$0x7]  ;;  %s968_s24 = smov (!%p410_p9, %s778_s24), 3 }
  0x17   : > { %s405_s10 = scalar_lea.vmem %s943_s2, %s688_s22  ;;  %v452_v21 = vunpack.c.l.bf16 %v419_v17  ;;  %v458_v22 = vunpack.c.l.bf16 %v420_v18  ;;  %s689_s8 = sshll.u32 %s962_s25, 2 }
  0x18   : > { %v436_v9 = vmul.f32 %v745_v2, %v432_v7  ;;  %v442_v10 = vmul.f32 %v746_v3, %v438_v8  ;;  %v447_v11 = vmul.f32 %v747_v4, %v432_v7  ;;  %v421_v19 = vld [vmem:[%s405_s10] sm:$0x7]  ;;  %v422_v23 = vld [vmem:[%s405_s10 + $0x4] sm:$0x7]  ;;  %s413_s22 = sadd.s32 %s689_s8, %s968_s24 }
  0x19   : > { %v456_v24 = vmul.f32 %v748_v12, %v452_v21  ;;  %v462_v25 = vmul.f32 %v749_v15, %v458_v22  ;;  %v467_v26 = vmul.f32 %v750_v16, %v452_v21  ;;  %v472_v27 = vunpack.c.l.bf16 %v421_v19  ;;  %s690_s17 = sshll.u32 %s413_s22, 2 }
  0x1a   : > { %v443_v13 = vadd.f32 %v442_v10, %v436_v9  ;;  %v449_v14 = vrot.slane %v447_v11, 1  ;;  %v478_v32 = vunpack.c.l.bf16 %v422_v23  ;;  %s415_s13 = scalar_lea.vmem %s948_s7, %s690_s17 }
  0x1b   : > { %v469_v31 = vrot.slane %v467_v26, 1  ;;  %v476_v35 = vmul.f32 %v751_v28, %v472_v27  ;;  %v487_v36 = vmul.f32 %v753_v29, %v472_v27 }
  0x1c   : > { %v451_v20 = vadd.f32 %v449_v14, %v443_v13  ;;  %v482_v38 = vmul.f32 %v752_v33, %v478_v32 }
  0x1d   : > { %v489_v40 = vrot.slane %v487_v36, 1 }
  0x1e   : > { %v457_v30 = vadd.f32 %v456_v24, %v451_v20 }
  0x20   : > { %v463_v34 = vadd.f32 %v462_v25, %v457_v30 }
  0x22   : > { %v471_v37 = vadd.f32 %v469_v31, %v463_v34 }
  0x24   : > { %v477_v39 = vadd.f32 %v476_v35, %v471_v37 }
  0x26   : > { %v483_v41 = vadd.f32 %v482_v38, %v477_v39 }
  0x28   : > { %v491_v43 = vadd.f32 %v489_v40, %v483_v41 }
  0x2a   : > { %v496_v44 = vadd.f32 %v754_v42, %v491_v43 }
  0x2c   : > { %v497_v45 = vmax.f32 %v496_v44, 0.0 }
  0x2e   : > { %v498_v46 = vpack.c.bf16 %v497_v45, %v497_v45 }
  0x30   : > { %699 = vmatmul.msk.bf16.vlgmr.msra.gmra.mxu0 %vm519_vm0, %v498_v46 }
  0xad   : > { %v532_v48 = vpop.f32.mrf.mxu0 }
  0xae   : > { %v533_v49 = vadd.f32 %v755_v47, %v532_v48 }
  0xb0   : > { %v536_v50 = vmax.f32 %v533_v49, 0.0 }
  0xb2   : > { %537 = vst [vmem:[%s415_s13] sm:$0xf] %v536_v50 }
  0xb5   : > { %v534_v51 = vpop.f32.mrf.mxu0 }
  0xb6 PF: > { %s17_s28 = sadd.s32 1, %s794_s28   ;;  %s951_s24 = smov %s786_s26 }
  0xb7   : > { %p14_p10 = scmp.ge.s32.totalorder %s17_s28, 10   ;;  %s952_s25 = smov %s790_s27 }
  0xb8   : > { %s953_s26 = smov %s956_s29  ;;  %s954_s27 = smov %s960_s30 }
  0xb9   :  { %16 = sbr.rel (!%p14_p10) target bundleno = 3 (0x3), region = 84 }

</bundles_post_ra>
